<compile_context>
chip_gen: v6e
topology: v6e:2x2x1
jax: 0.10.0
libtpu: 0.0.40
codegen_flags: <defaults>
</compile_context>

<pallas_src>
import functools

import jax
import jax.numpy as jnp
import numpy as np
from jax.experimental import pallas as pl
from jax.experimental.pallas import tpu as pltpu


def _focal_loss_kernel(x_ref, t_ref, out_ref, *, gamma, log_eps, log_1m_eps,
                       n_rows, n_classes, tm, inner_steps, class_axis,
                       use_mxu_sums):
    """One (tm-sample x C-class) tile of the focal-loss sum.

    class_axis == 0: x_ref is (C, tm)  (lane-dense samples), t_ref is (1, tm).
    class_axis == 1: x_ref is (tm, C)  (row-major),           t_ref is (tm, 1).
    out_ref: (1, 1) float32 partial sum in SMEM, resident across the inner
    ("arbitrary") grid axis; one partial per leading "parallel" grid index.
    """
    c = pl.program_id(0)          # partial-sum / core index ("parallel")
    i = pl.program_id(1)          # row-block index within this core

    @pl.when(i == 0)
    def _init():
        out_ref[0, 0] = jnp.float32(0.0)

    sample_axis = 1 - class_axis
    x = x_ref[...].astype(jnp.float32)
    t = t_ref[...]                                       # int32 targets

    # log p_target via log-sum-exp over the class axis; only the target class
    # contributes to the loss (y is one-hot), so the log / pow work runs on a
    # single per-sample column/row instead of the full tile.
    m = jnp.max(x, axis=class_axis, keepdims=True)
    e = jnp.exp(x - m)
    cls = jax.lax.broadcasted_iota(jnp.int32, x.shape, class_axis)
    x_sel = jnp.where(cls == t, x, 0.0)

    if use_mxu_sums and class_axis == 1:
        # v7x option: offload the two class-axis reductions to the (otherwise
        # idle) MXU with an all-ones RHS; the XLU keeps only the max.
        ones = jnp.ones((x.shape[1], 128), jnp.float32)
        s = jnp.dot(e, ones, preferred_element_type=jnp.float32,
                    precision=jax.lax.Precision.HIGHEST)[:, :1]
        x_t = jnp.dot(x_sel, ones, preferred_element_type=jnp.float32,
                      precision=jax.lax.Precision.HIGHEST)[:, :1]
    else:
        s = jnp.sum(e, axis=class_axis, keepdims=True)
        x_t = jnp.sum(x_sel, axis=class_axis, keepdims=True)

    # Clamp in log space == clip(p, eps, 1 - eps) in the reference.
    log_pt = jnp.clip((x_t - m) - jnp.log(s),
                      jnp.float32(log_eps), jnp.float32(log_1m_eps))
    loss = -log_pt
    if gamma != 0.0:            # compile-time fast path for the default gamma=0
        one_minus_p = 1.0 - jnp.exp(log_pt)      # matches the reference's (1-p)
        g = float(gamma)
        if g == int(g) and 0 < g <= 8:
            # Integer gamma: cheap VPU multiplies instead of pow (log+exp, EUP).
            w = one_minus_p
            for _ in range(int(g) - 1):
                w = w * one_minus_p
            loss = loss * w
        else:
            loss = loss * one_minus_p ** jnp.float32(g)

    # Mask padded tail samples and out-of-range targets (the reference one_hot
    # scatter contributes nothing for those rows).
    base = (c * inner_steps + i) * tm
    rows = base + jax.lax.broadcasted_iota(jnp.int32, loss.shape, sample_axis)
    valid = (rows < n_rows) & (t >= 0) & (t < n_classes)
    loss = jnp.where(valid, loss, 0.0)

    out_ref[0, 0] += jnp.sum(loss)


def _pick_tile_rows(n, c, itemsize, lane_dense, tm, vmem_limit_bytes):
    """Rows per grid step, sized from a VMEM / per-step byte budget."""
    align = 128 if lane_dense else 8
    if tm is None:
        if lane_dense:
            # (C, tm) logits block (sublane-padded to >= 8 rows) and (1, tm)
            # int32 target block (sublane-padded to 8 rows).
            x_row = max(c, 8) * itemsize
            t_row = 8 * 4
        else:
            # (tm, C) logits block and (tm, 1) int32 target block whose single
            # lane pads to 128 (the 128x VMEM blowup flagged in review).
            x_row = c * itemsize
            t_row = 128 * 4
        io_budget = min(vmem_limit_bytes // 2, 24 * 1024 * 1024)  # dbl-buffered ins
        step_budget = 4 * 1024 * 1024          # ~4 MiB of logits HBM per grid step
        tm = min(io_budget // (2 * (x_row + t_row)),
                 step_budget // max(c * itemsize, 1))
        tm = max(align, int(tm))
    else:
        tm = max(1, int(tm))
    if tm >= n:
        return n                                # full-extent block is legal
    tm = max(align, (tm // align) * align)
    return n if tm >= n else tm


def focal_loss(x, target, gamma=0.0, eps=1e-7, tm=None, lane_dense=None,
               use_mxu_sums=None, vmem_limit_bytes=40 * 1024 * 1024):
    """Scalar focal-loss sum matching the PyTorch FocalLoss.forward.

    x: (N, C) float32/bfloat16 logits; target: (N,) integer class indices.
    """
    n, c = x.shape
    itemsize = jnp.dtype(x.dtype).itemsize
    if lane_dense is None:
        lane_dense = c <= 64                 # samples-on-lanes layout for small C
    if use_mxu_sums is None:
        use_mxu_sums = (not lane_dense) and c >= 128   # v7x: sums off the XLU

    tm = _pick_tile_rows(n, c, itemsize, lane_dense, tm, vmem_limit_bytes)
    n_blocks = pl.cdiv(n, tm)
    # Two partial sums (one per TensorCore on v7x) only when the block count
    # splits evenly -> no clamped duplicate block; harmless on 1-TC chips.
    ncores = 2 if (n_blocks >= 4 and n_blocks % 2 == 0) else 1
    inner = n_blocks // ncores

    if lane_dense:
        # TODO(synk): producer-side (C, N) logits would make this transpose free.
        x_in = jnp.transpose(x)                         # (C, N): classes on sublanes
        t_in = target.reshape(1, n).astype(jnp.int32)   # (1, N): lane-dense targets
        x_spec = pl.BlockSpec((c, tm), lambda ci, i: (0, ci * inner + i))
        t_spec = pl.BlockSpec((1, tm), lambda ci, i: (0, ci * inner + i))
        class_axis = 0
    else:
        x_in = x
        t_in = target.reshape(n, 1).astype(jnp.int32)
        x_spec = pl.BlockSpec((tm, c), lambda ci, i: (ci * inner + i, 0))
        t_spec = pl.BlockSpec((tm, 1), lambda ci, i: (ci * inner + i, 0))
        class_axis = 1

    kernel = functools.partial(
        _focal_loss_kernel,
        gamma=float(gamma),
        log_eps=float(np.log(eps)),
        log_1m_eps=float(np.log1p(-eps)),
        n_rows=n, n_classes=c, tm=tm, inner_steps=inner,
        class_axis=class_axis, use_mxu_sums=bool(use_mxu_sums))

    partials = pl.pallas_call(
        kernel,
        out_shape=jax.ShapeDtypeStruct((ncores, 1), jnp.float32),
        grid_spec=pltpu.PrefetchScalarGridSpec(
            num_scalar_prefetch=0,
            grid=(ncores, inner),
            in_specs=[x_spec, t_spec],
            out_specs=pl.BlockSpec((1, 1), lambda ci, i: (ci, 0),
                                   memory_space=pltpu.SMEM),
        ),
        compiler_params=pltpu.CompilerParams(
            dimension_semantics=("parallel", "arbitrary"),
            vmem_limit_bytes=int(vmem_limit_bytes)),
    )(x_in, t_in)
    return jnp.sum(partials)


def _focal_loss_ref(x, target, gamma=0.0, eps=1e-7):
    """Pure-JAX mirror of the PyTorch FocalLoss.forward."""
    p = jax.nn.softmax(x.astype(jnp.float32), axis=-1)
    p = jnp.clip(p, eps, 1.0 - eps)
    y = jax.nn.one_hot(target, x.shape[-1], dtype=jnp.float32)
    loss = -1.0 * y * jnp.log(p) * (1.0 - p) ** gamma
    return jnp.sum(loss)


if __name__ == "__main__":
    keys = jax.random.split(jax.random.PRNGKey(0), 8)

    def check(name, out, ref, rtol=1e-5, atol=1e-3):
        out = np.asarray(jax.block_until_ready(out))
        ref = np.asarray(ref)
        assert np.allclose(out, ref, rtol=rtol, atol=atol), (name, out, ref)

    # 1) Small lane-dense case (single block): gamma=0 fast path and gamma=2.
    n, c = 16, 8
    x = jax.random.normal(keys[0], (n, c), dtype=jnp.float32)
    t = jax.random.randint(keys[1], (n,), 0, c, dtype=jnp.int32)
    check("lane_g0", focal_loss(x, t, gamma=0.0), _focal_loss_ref(x, t, gamma=0.0))
    check("lane_g2", focal_loss(x, t, gamma=2.0), _focal_loss_ref(x, t, gamma=2.0))

    # 2) Lane-dense multi-block grid with a masked tail (odd blocks -> 1 partial).
    n, c = 300, 8
    x = jax.random.normal(keys[2], (n, c), dtype=jnp.float32)
    t = jax.random.randint(keys[3], (n,), 0, c, dtype=jnp.int32)
    check("lane_tail", focal_loss(x, t, gamma=2.0, tm=128),
          _focal_loss_ref(x, t, gamma=2.0))

    # 3) Lane-dense, even block count -> two partial sums (megacore split); bf16 in.
    n, c = 512, 8
    xb = jax.random.normal(keys[4], (n, c), dtype=jnp.float32).astype(jnp.bfloat16)
    t = jax.random.randint(keys[5], (n,), 0, c, dtype=jnp.int32)
    check("lane_bf16", focal_loss(xb, t, gamma=0.0, tm=128),
          _focal_loss_ref(xb, t, gamma=0.0), rtol=1e-4)

    # 4) Row-major path (C > 64): exact VPU/XLU reductions, then the MXU-sum option
    #    (looser tolerance: reduced-precision matmul is acceptable for a loss).
    n, c = 96, 192
    x = jax.random.normal(keys[6], (n, c), dtype=jnp.float32)
    t = jax.random.randint(keys[7], (n,), 0, c, dtype=jnp.int32)
    check("row_g2", focal_loss(x, t, gamma=2.0, tm=24, use_mxu_sums=False),
          _focal_loss_ref(x, t, gamma=2.0))
    check("row_mxu", focal_loss(x, t, gamma=2.0, tm=24, use_mxu_sums=True),
          _focal_loss_ref(x, t, gamma=2.0), rtol=5e-3, atol=1e-2)

    print("KERNEL_OK")
</pallas_src>

<mosaic_0001>
module attributes {stable_mosaic.version = 11 : i64} {
  func.func @_focal_loss_kernel(%arg0: i32, %arg1: i32, %arg2: memref<8x16xf32, #tpu.memory_space<vmem>>, %arg3: memref<1x16xi32, #tpu.memory_space<vmem>>, %arg4: memref<1x1xf32, #tpu.memory_space<smem>>) attributes {dimension_semantics = [#tpu.dimension_semantics<parallel>, #tpu.dimension_semantics<arbitrary>], iteration_bounds = array<i64: 1, 1>, scalar_prefetch = 0 : i64, scratch_operands = 0 : i64, tpu.core_type = #tpu.core_type<tc>, window_params = [{transform_indices = @transform_0, window_bounds = array<i64: 8, 16>}, {transform_indices = @transform_1, window_bounds = array<i64: 1, 16>}, {transform_indices = @transform_2, window_bounds = array<i64: 1, 1>}]} {
    %c0_i32 = arith.constant 0 : i32
    %0 = arith.cmpi eq, %arg1, %c0_i32 : i32
    %1 = arith.extui %0 : i1 to i32
    %c0_i32_0 = arith.constant 0 : i32
    %2 = arith.cmpi ne, %1, %c0_i32_0 : i32
    scf.if %2 {
      %cst_18 = arith.constant 0.000000e+00 : f32
      %c0_19 = arith.constant 0 : index
      %c0_20 = arith.constant 0 : index
      %51 = memref.load %arg4[%c0_19, %c0_20] : memref<1x1xf32, #tpu.memory_space<smem>>
      memref.store %cst_18, %arg4[%c0_19, %c0_20] : memref<1x1xf32, #tpu.memory_space<smem>>
    } else {
    }
    %c0 = arith.constant 0 : index
    %c0_1 = arith.constant 0 : index
    %3 = vector.load %arg2[%c0, %c0_1] : memref<8x16xf32, #tpu.memory_space<vmem>>, vector<8x16xf32>
    %c0_2 = arith.constant 0 : index
    %c0_3 = arith.constant 0 : index
    %4 = vector.load %arg3[%c0_2, %c0_3] : memref<1x16xi32, #tpu.memory_space<vmem>>, vector<1x16xi32>
    %cst = arith.constant dense<0xFF800000> : vector<16xf32>
    %5 = vector.multi_reduction <maximumf>, %3, %cst [0] : vector<8x16xf32> to vector<16xf32>
    %6 = vector.shape_cast %5 : vector<16xf32> to vector<1x16xf32>
    %7 = vector.broadcast %6 : vector<1x16xf32> to vector<8x16xf32>
    %8 = arith.subf %3, %7 : vector<8x16xf32>
    %9 = math.exp %8 : vector<8x16xf32>
    %10 = tpu.iota {dimensions = array<i32: 0>} : vector<8x16xi32>
    %11 = vector.broadcast %4 : vector<1x16xi32> to vector<8x16xi32>
    %12 = arith.cmpi eq, %10, %11 : vector<8x16xi32>
    %cst_4 = arith.constant 0.000000e+00 : f32
    %13 = vector.broadcast %cst_4 : f32 to vector<8x16xf32>
    %14 = arith.select %12, %3, %13 : vector<8x16xi1>, vector<8x16xf32>
    %cst_5 = arith.constant dense<0.000000e+00> : vector<16xf32>
    %15 = vector.multi_reduction <add>, %9, %cst_5 [0] : vector<8x16xf32> to vector<16xf32>
    %16 = vector.shape_cast %15 : vector<16xf32> to vector<1x16xf32>
    %cst_6 = arith.constant dense<0.000000e+00> : vector<16xf32>
    %17 = vector.multi_reduction <add>, %14, %cst_6 [0] : vector<8x16xf32> to vector<16xf32>
    %18 = vector.shape_cast %17 : vector<16xf32> to vector<1x16xf32>
    %19 = arith.subf %18, %6 : vector<1x16xf32>
    %20 = math.log %16 : vector<1x16xf32>
    %21 = arith.subf %19, %20 : vector<1x16xf32>
    %cst_7 = arith.constant -16.1180954 : f32
    %cst_8 = arith.constant -1.00000008E-7 : f32
    %22 = vector.broadcast %cst_7 : f32 to vector<1x16xf32>
    %23 = arith.maximumf %22, %21 : vector<1x16xf32>
    %24 = vector.broadcast %cst_8 : f32 to vector<1x16xf32>
    %25 = arith.minimumf %24, %23 : vector<1x16xf32>
    %cst_9 = arith.constant 0.000000e+00 : f32
    %26 = vector.broadcast %cst_9 : f32 to vector<1x16xf32>
    %27 = arith.subf %26, %25 : vector<1x16xf32>
    %c1_i32 = arith.constant 1 : i32
    %28 = arith.muli %arg0, %c1_i32 : i32
    %29 = arith.addi %28, %arg1 : i32
    %c16_i32 = arith.constant 16 : i32
    %30 = arith.muli %29, %c16_i32 : i32
    %31 = tpu.iota {dimensions = array<i32: 1>} : vector<1x16xi32>
    %32 = vector.broadcast %30 : i32 to vector<1x16xi32>
    %33 = arith.addi %32, %31 : vector<1x16xi32>
    %c16_i32_10 = arith.constant 16 : i32
    %34 = vector.broadcast %c16_i32_10 : i32 to vector<1x16xi32>
    %35 = arith.cmpi slt, %33, %34 : vector<1x16xi32>
    %c0_i32_11 = arith.constant 0 : i32
    %36 = vector.broadcast %c0_i32_11 : i32 to vector<1x16xi32>
    %37 = arith.cmpi sge, %4, %36 : vector<1x16xi32>
    %38 = arith.andi %35, %37 : vector<1x16xi1>
    %c8_i32 = arith.constant 8 : i32
    %39 = vector.broadcast %c8_i32 : i32 to vector<1x16xi32>
    %40 = arith.cmpi slt, %4, %39 : vector<1x16xi32>
    %41 = arith.andi %38, %40 : vector<1x16xi1>
    %cst_12 = arith.constant 0.000000e+00 : f32
    %42 = vector.broadcast %cst_12 : f32 to vector<1x16xf32>
    %43 = arith.select %41, %27, %42 : vector<1x16xi1>, vector<1x16xf32>
    %c0_13 = arith.constant 0 : index
    %c0_14 = arith.constant 0 : index
    %44 = memref.load %arg4[%c0_13, %c0_14] : memref<1x1xf32, #tpu.memory_space<smem>>
    %45 = vector.shape_cast %43 : vector<1x16xf32> to vector<1x1x16xf32>
    %cst_15 = arith.constant dense<0.000000e+00> : vector<1xf32>
    %46 = vector.multi_reduction <add>, %45, %cst_15 [1, 2] : vector<1x1x16xf32> to vector<1xf32>
    %47 = vector.shape_cast %46 : vector<1xf32> to vector<1x1x1xf32>
    %48 = vector.extract %47[0, 0, 0] : f32 from vector<1x1x1xf32>
    %49 = arith.addf %44, %48 : f32
    %c0_16 = arith.constant 0 : index
    %c0_17 = arith.constant 0 : index
    %50 = memref.load %arg4[%c0_16, %c0_17] : memref<1x1xf32, #tpu.memory_space<smem>>
    memref.store %49, %arg4[%c0_16, %c0_17] : memref<1x1xf32, #tpu.memory_space<smem>>
    return
  }
  func.func @transform_0(%arg0: i32, %arg1: i32) -> (i32, i32) {
    %c1_i32 = arith.constant 1 : i32
    %0 = arith.muli %arg0, %c1_i32 : i32
    %1 = arith.addi %0, %arg1 : i32
    %c0_i32 = arith.constant 0 : i32
    %c0_i32_0 = arith.constant 0 : i32
    return %c0_i32, %1 : i32, i32
  }
  func.func @transform_1(%arg0: i32, %arg1: i32) -> (i32, i32) {
    %c1_i32 = arith.constant 1 : i32
    %0 = arith.muli %arg0, %c1_i32 : i32
    %1 = arith.addi %0, %arg1 : i32
    %c0_i32 = arith.constant 0 : i32
    %c0_i32_0 = arith.constant 0 : i32
    return %c0_i32, %1 : i32, i32
  }
  func.func @transform_2(%arg0: i32, %arg1: i32) -> (i32, i32) {
    %c0_i32 = arith.constant 0 : i32
    %c0_i32_0 = arith.constant 0 : i32
    return %arg0, %c0_i32 : i32, i32
  }
}

</mosaic_0001>

<bundles_post_ra>
// kernel: tpu_custom_call.1
= control target key start
LH: loop header
LB: loop body
LE: loop exit
PB: predicated region body
PF: predicated region fallthrough
CT: control target
= control target key end

     0   :  { %7 = vsyncpa [#allocation3], 0  ;;  %s204_s0 = inlined_call_operand.hbm [shape: f32[8,16], index: 0, kind: input, shape index: {}]   ;;  %s205_s1 = inlined_call_operand.vmem [shape: s32[1,16], index: 1, kind: input, shape index: {}]   ;;  %s206_s2 = inlined_call_operand.hbm [shape: f32[1,1], index: 2, kind: output, shape index: {}]  }
   0x1   :  { %8 = vsyncpa [#allocation4], 0  ;;  %s175_s9 = smov [#allocation2]  }
   0x2   :  { %s18_s10 = sshll.u32 %s175_s9, 4  ;;  %s19_s10 = int_to_ptr.vmem [resolvable:$true] %s18_s10 }
   0x3   :  { %s151_s11 = scalar_lea.vmem %s19_s10, 128  ;;  %p156_p1 = scmp.lt.s32.totalorder %s19_s10, %s19_s10 }
   0x4   :  { %p152_p0 = scmp.ne.s32.totalorder %s19_s10, %s151_s11  ;;  %p157_p2 = scmp.lt.s32.totalorder %s151_s11, %s151_s11 }
   0x6   :  { %p158_p3 = por %p157_p2, %p156_p1 }
   0x8   :  { %p159_p4 = pnand %p158_p3, %p152_p0 }
   0xa   :  { %162 = shalt.err (!%p159_p4)
}
   0xb   :  { %21 = dma.hbm_to_vmem [thread:$0]  %s204_s0, 128, %s19_s10, [#allocation3]  }
   0xc   :  { %171 = dma.done.wait [#allocation3], 128  }
   0xd   :  { %172 = vsyncadd [#allocation3], 4294967168  ;;  %vm50_vm0 = vcmask 130048   ;;  %v48_v0 = vld [vmem:[#allocation2] sm:$0xff]  ;;  %v61_v6 = vlaneseq  ;;  %vm103_vm7 = vcmask 122880  }
   0xe   :  { %v51_v1 = vsel %vm50_vm0, %v48_v0, -inf  ;;  %v49_v13 = vld [vmem:[%s205_s1] sm:$0x1]  ;;  %s176_s1 = smov [#allocation5]  }
   0xf   :  { %v52_v2 = vrot.slane %v51_v1, 4  ;;  %v62_v9 = vshrl.u32 %v61_v6, 7  ;;  %v93_v31 = vand.u32 127, %v61_v6  ;;  %vm97_vm3 = vcmp.ge.s32.totalorder %v49_v13, 0 }
  0x10   :  { %vm99_vm5 = vcmp.lt.s32.totalorder %v49_v13, 8 }
  0x11   :  { %v53_v3 = vmax.f32 %v51_v1, %v52_v2  ;;  %v65_v12 = vsub.s32 0, %v62_v9  ;;  %vm96_vm2 = vcmp.lt.s32.totalorder %v93_v31, 16 }
  0x12   :  { %vm98_vm4 = vmand %vm96_vm2, %vm97_vm3 }
  0x13   :  { %v54_v4 = vrot.slane %v53_v3, 2  ;;  %v66_v14 = vrot.slane %v49_v13, %v65_v12  ;;  %vm100_vm6 = vmand %vm98_vm4, %vm99_vm5 }
  0x15   :  { %v55_v5 = vmax.f32 %v53_v3, %v54_v4  ;;  %vm67_vm1 = vcmp.eq.s32.totalorder %v62_v9, %v66_v14 }
  0x16   :  { %v68_v15 = vsel %vm67_vm1, %v48_v0, 0.0 }
  0x17   :  { %v56_v7 = vrot.slane %v55_v5, 1  ;;  %v76_v16 = vsel %vm50_vm0, %v68_v15, 0.0 }
  0x18   :  { %v77_v20 = vrot.slane %v76_v16, 4 }
  0x19   :  { %v57_v8 = vmax.f32 %v55_v5, %v56_v7 }
  0x1a   :  { %v78_v23 = vadd.f32 %v77_v20, %v76_v16 }
  0x1b   :  { %v58_v10 = vsub.f32 %v48_v0, %v57_v8 }
  0x1c   :  { %v79_v26 = vrot.slane %v78_v23, 2 }
  0x1d   :  { %v59_v11 = vmul.f32 1.442695, %v58_v10 }
  0x1e   :  { %v80_v28 = vadd.f32 %v79_v26, %v78_v23 }
  0x1f   :  { %139 = vpow2.f32 %v59_v11 }
  0x20   :  { %v81_v29 = vrot.slane %v80_v28, 1 }
  0x22   :  { %v82_v30 = vadd.f32 %v81_v29, %v80_v28 }
  0x24   :  { %v83_v32 = vsub.f32 %v82_v30, %v57_v8 }
  0x2c   :  { %v140_v17 = vpop.eup %139 }
  0x2d   :  { %v69_v18 = vsel %vm50_vm0, %v140_v17, 0.0 }
  0x2e   :  { %v70_v19 = vrot.slane %v69_v18, 4 }
  0x30   :  { %v71_v21 = vadd.f32 %v70_v19, %v69_v18 }
  0x32   :  { %v72_v22 = vrot.slane %v71_v21, 2 }
  0x34   :  { %v73_v24 = vadd.f32 %v72_v22, %v71_v21 }
  0x36   :  { %v74_v25 = vrot.slane %v73_v24, 1 }
  0x38   :  { %v75_v27 = vadd.f32 %v74_v25, %v73_v24 }
  0x3a   :  { %141 = vlog2.f32 %v75_v27 }
  0x47   :  { %v142_v33 = vpop.eup %141 }
  0x48   :  { %v85_v34 = vmul.f32 0.6931472, %v142_v33 }
  0x4a   :  { %v86_v35 = vsub.f32 %v83_v32, %v85_v34 }
  0x4c   :  { %v87_v36 = vmax.f32 %v86_v35, -16.118095 }
  0x4e   :  { %v88_v37 = vmin.f32 %v87_v36, -1.0000001e-07 }
  0x50   :  { %v89_v38 = vsub.f32 0.0, %v88_v37 }
  0x52   :  { %v101_v39 = vsel %vm100_vm6, %v89_v38, 0.0 }
  0x53   :  { %v104_v40 = vsel %vm103_vm7, %v101_v39, 0.0 }
  0x54   :  { %105 = vadd.xlane.f32.xlu0 %v104_v40 }
  0xdd   :  { %v106_v41 = vpop.xlane.xlu0 %105 }
  0xde   :  { %v107_v42 = vrot.slane %v106_v41, 4 }
  0xe0   :  { %v108_v43 = vadd.f32 %v107_v42, %v106_v41 }
  0xe2   :  { %v109_v44 = vrot.slane %v108_v43, 2 }
  0xe4   :  { %v110_v45 = vadd.f32 %v109_v44, %v108_v43 }
  0xe6   :  { %v111_v46 = vrot.slane %v110_v45, 1 }
  0xe8   :  { %v112_v47 = vadd.f32 %v111_v46, %v110_v45 }
  0xea   :  { %134 = vpush %v112_v47 }
 0x11b   :  { %s135_s0 = spop %134 }
 0x11c   :  { %116 = sst [smem:[#allocation5]] %s135_s0 }
 0x11d   :  { %124 = dma.smem_to_hbm %s176_s1, 16, %s206_s2, [#allocation4]  }
 0x11e   :  { %173 = dma.done.wait [#allocation4], 16  }
 0x11f   :  { %174 = vsyncadd [#allocation4], 4294967280 }
 0x120   :  { %128 = sfence }
 0x121   :  { %129 = vsyncpa [#allocation3], 1 }
 0x122   :  { %130 = vsyncpa [#allocation4], 1 }

</bundles_post_ra>
